<compile_context>
chip_gen: v7x
topology: tpu7x:2x2x1
jax: 0.10.0
libtpu: 0.0.40
codegen_flags: <defaults>
</compile_context>

<pallas_src>
import math

import jax
import jax.numpy as jnp
from jax.experimental import pallas as pl
from jax.experimental.pallas import tpu as pltpu

EPS = 1e-5
LANE = 128


# ------------------------- structure helpers (plain Python, mirror PyTorch) ----
def get_hidden_layer_size(input_size, output_size, target_n_parameters):
    return (target_n_parameters - output_size) // (input_size + output_size + 1)


def parameters_in_linear(input_size, output_size):
    return input_size * output_size + output_size


def get_hidden_units_structure(input_size, output_size, parameters_target,
                               n_hidden=5, max_hidden_layer_size=99999999):
    units_list = [input_size]
    single_interm = get_hidden_layer_size(input_size, output_size, parameters_target)
    if single_interm <= 400:
        units_list.append(single_interm)
        return units_list
    first_layer_params = parameters_in_linear(input_size, 100)
    last_layer_params = parameters_in_linear(100, output_size)
    remaining_parameters = parameters_target - first_layer_params - last_layer_params
    units_per_layer = int(max(min([(remaining_parameters / n_hidden) ** 0.5,
                                   max_hidden_layer_size]), output_size))
    units_list.extend(units_per_layer for _ in range(n_hidden))
    units_list.append(100)
    return units_list


def round_up(x, m):
    return ((x + m - 1) // m) * m


# ------------------------------- Pallas kernel ---------------------------------
def make_mlp_kernel(n_hid, w_pad, offs):
    """Kernel: [folded BN1+Linear0 -> ReLU] -> [Linear -> ReLU]* -> BN2 -> Linear.

    All parameters live in one packed (R, w_pad) f32 buffer; `offs` holds the
    static row offsets (Python ints) of each section.
    Padded lanes (beyond each layer's true width) stay exactly zero throughout.
    """
    vec = offs["vec"]                 # row 0: b0; rows 1..n_hid-1: b_i;
    w0_off = offs["w0"]               # then bn2_gamma, bn2_beta, b_out
    w_hidden_offs = offs["w_hidden"]
    w_out_off = offs["w_out"]

    def kernel(x_ref, p_ref, o_ref):
        x = x_ref[...]                                  # (N, 2) f32
        P = p_ref[...]                                  # (R, w_pad) f32

        # ---- first Linear (BN1 already folded in) as VPU broadcast-FMAs (K=2)
        b0 = P[vec:vec + 1, :]
        w0r0 = P[w0_off:w0_off + 1, :]
        w0r1 = P[w0_off + 1:w0_off + 2, :]
        h = x[:, 0:1] * w0r0 + x[:, 1:2] * w0r1 + b0
        h = jnp.maximum(h, 0.0)

        # ---- remaining hidden Linear + ReLU layers (MXU, lane-padded)
        for i in range(1, n_hid):
            wi = P[w_hidden_offs[i - 1]:w_hidden_offs[i - 1] + w_pad, :]
            bi = P[vec + i:vec + i + 1, :]
            h = jnp.maximum(
                jnp.dot(h, wi, preferred_element_type=jnp.float32) + bi, 0.0)

        # ---- BatchNorm1d #2 (training mode, biased variance) - one pass stats
        bn2_g = P[vec + n_hid:vec + n_hid + 1, :]
        bn2_b = P[vec + n_hid + 1:vec + n_hid + 2, :]
        mean2 = jnp.mean(h, axis=0, keepdims=True)
        var2 = jnp.maximum(
            jnp.mean(h * h, axis=0, keepdims=True) - mean2 * mean2, 0.0)
        h = (h - mean2) * jax.lax.rsqrt(var2 + EPS) * bn2_g + bn2_b

        # ---- output Linear; lane-dense (N, w_pad) store (unmasked vst)
        w_out = P[w_out_off:w_out_off + w_pad, :]
        b_out = P[vec + n_hid + 2:vec + n_hid + 3, :]
        o_ref[...] = (jnp.dot(h, w_out, preferred_element_type=jnp.float32)
                      + b_out)

    return kernel


# ---------------------- parameter packing (JAX wrapper level) -------------------
def pack_params(params, units_list, output_size, x):
    """Fold BN1 into linear0 and pack everything into one (R, w_pad) buffer."""
    n_hid = len(params["hidden"])
    widths = [int(u) for u in units_list[1:]] + [int(output_size)]
    w_pad = round_up(max(widths), LANE)

    # --- fold BN1 (batch stats of the fixed meshgrid are constants)
    mean1 = jnp.mean(x, axis=0)                                   # (2,)
    var1 = jnp.mean((x - mean1[None, :]) ** 2, axis=0)            # biased
    scale = params["bn1_g"].reshape(-1) * jax.lax.rsqrt(var1 + EPS)
    shift = params["bn1_b"].reshape(-1) - mean1 * scale
    w0, b0 = params["hidden"][0]                                  # (2,u1),(1,u1)
    w0f = scale[:, None] * w0
    b0f = shift[None, :] @ w0 + b0                                # (1, u1)

    # --- static row layout
    n_vec = n_hid + 3                        # b0, b1..b_{n-1}, bn2_g, bn2_b, b_out
    vec_rows = round_up(n_vec, 8)
    offs = {"vec": 0, "w0": vec_rows}
    row = vec_rows + 8                       # w0 section (2 rows padded to 8)
    w_hidden_offs = []
    for _ in range(1, n_hid):
        w_hidden_offs.append(row)
        row += w_pad
    offs["w_hidden"] = w_hidden_offs
    offs["w_out"] = row
    total_rows = row + w_pad

    P = jnp.zeros((total_rows, w_pad), jnp.float32)
    # vectors
    P = P.at[0, :b0f.shape[1]].set(b0f[0])
    for i in range(1, n_hid):
        bi = params["hidden"][i][1]
        P = P.at[i, :bi.shape[1]].set(bi[0])
    last = int(units_list[-1])
    P = P.at[n_hid, :last].set(params["bn2_g"].reshape(-1))
    P = P.at[n_hid + 1, :last].set(params["bn2_b"].reshape(-1))
    P = P.at[n_hid + 2, :output_size].set(params["b_out"].reshape(-1))
    # weights
    P = P.at[offs["w0"]:offs["w0"] + 2, :w0f.shape[1]].set(w0f)
    for i in range(1, n_hid):
        wi = params["hidden"][i][0]
        r = w_hidden_offs[i - 1]
        P = P.at[r:r + wi.shape[0], :wi.shape[1]].set(wi)
    wout = params["w_out"]
    P = P.at[offs["w_out"]:offs["w_out"] + wout.shape[0], :output_size].set(wout)

    return P, w_pad, offs, n_hid


def mlp_parametrization_forward(params, meshgrid, kernel_shape, units_list):
    n1, n2, _ = meshgrid.shape
    N = n1 * n2
    x = meshgrid.reshape(N, 2).astype(jnp.float32)
    out_feats = int(kernel_shape[0] * kernel_shape[1])

    packed, w_pad, offs, n_hid = pack_params(params, units_list, out_feats, x)
    kernel = make_mlp_kernel(n_hid, w_pad, offs)

    vmem_spec = pl.BlockSpec(memory_space=pltpu.MemorySpace.VMEM)
    out = pl.pallas_call(
        kernel,
        out_shape=jax.ShapeDtypeStruct((N, w_pad), jnp.float32),
        in_specs=[vmem_spec, vmem_spec],
        out_specs=vmem_spec,
    )(x, packed)

    return out[:, :out_feats].reshape(n1, n2, kernel_shape[0], kernel_shape[1])


# ------------------------------- parameter init --------------------------------
def init_linear(key, fan_in, fan_out):
    # PyTorch default Linear init: U(-1/sqrt(fan_in), 1/sqrt(fan_in)) for W and b.
    kw, kb = jax.random.split(key)
    bound = 1.0 / math.sqrt(fan_in)
    w = jax.random.uniform(kw, (fan_in, fan_out), jnp.float32, -bound, bound)
    b = jax.random.uniform(kb, (1, fan_out), jnp.float32, -bound, bound)
    return w, b


def build_params(key, units_list, output_size):
    params = {
        "bn1_g": jnp.ones((1, units_list[0]), jnp.float32),
        "bn1_b": jnp.zeros((1, units_list[0]), jnp.float32),
        "bn2_g": jnp.ones((1, units_list[-1]), jnp.float32),
        "bn2_b": jnp.zeros((1, units_list[-1]), jnp.float32),
        "hidden": [],
    }
    keys = jax.random.split(key, len(units_list))  # >= number of linears + 1
    for i, k_out in enumerate(units_list[1:]):
        w, b = init_linear(keys[i], units_list[i], k_out)
        params["hidden"].append((w, b))
    w_out, b_out = init_linear(keys[-1], units_list[-1], output_size)
    params["w_out"] = w_out
    params["b_out"] = b_out
    return params


# ------------------------------------ main --------------------------------------
if __name__ == "__main__":
    # Synthetic Conv2d the module parametrizes: Conv2d(4, 4, kernel_size=3, bias=True)
    out_channels, in_channels, kH, kW = 4, 4, 3, 3
    kernel_shape = (kH, kW)
    conv_parameters_total = out_channels * in_channels * kH * kW + out_channels  # 148
    out_mlp_layer_size = kH * kW  # 9

    units_list = get_hidden_units_structure(
        2, out_mlp_layer_size, conv_parameters_total,
        n_hidden=5, max_hidden_layer_size=250)

    key = jax.random.PRNGKey(0)
    params = build_params(key, units_list, out_mlp_layer_size)

    # Registered buffer: meshgrid over (out_channels, in_channels) in [-1, 1]
    xs = jnp.linspace(-1.0, 1.0, out_channels)
    ys = jnp.linspace(-1.0, 1.0, in_channels)
    meshgrid = jnp.stack(jnp.meshgrid(xs, ys, indexing="ij"), axis=-1)  # (4, 4, 2)

    # forward(_) ignores its input; pass a dummy for parity with the PyTorch API.
    dummy_input = jax.random.normal(jax.random.PRNGKey(1), (2, 4, 16, 16))
    _ = dummy_input  # unused by design

    result = mlp_parametrization_forward(params, meshgrid, kernel_shape, units_list)
    jax.block_until_ready(result)
    assert result.shape == (out_channels, in_channels, kH, kW)
    print("KERNEL_OK")
</pallas_src>

<mosaic_0001>
module attributes {stable_mosaic.version = 11 : i64} {
  func.func @kernel(%arg0: memref<16x2xf32, #tpu.memory_space<vmem>>, %arg1: memref<144x128xf32, #tpu.memory_space<vmem>>, %arg2: memref<16x128xf32, #tpu.memory_space<vmem>>) attributes {dimension_semantics = [], scalar_prefetch = 0 : i64, scratch_operands = 0 : i64, tpu.core_type = #tpu.core_type<tc>} {
    %c0 = arith.constant 0 : index
    %c0_0 = arith.constant 0 : index
    %0 = vector.load %arg0[%c0, %c0_0] : memref<16x2xf32, #tpu.memory_space<vmem>>, vector<16x2xf32>
    %c0_1 = arith.constant 0 : index
    %c0_2 = arith.constant 0 : index
    %1 = vector.load %arg1[%c0_1, %c0_2] : memref<144x128xf32, #tpu.memory_space<vmem>>, vector<144x128xf32>
    %2 = vector.extract_strided_slice %1 {offsets = [0, 0], sizes = [1, 128], strides = [1, 1]} : vector<144x128xf32> to vector<1x128xf32>
    %3 = vector.extract_strided_slice %1 {offsets = [8, 0], sizes = [1, 128], strides = [1, 1]} : vector<144x128xf32> to vector<1x128xf32>
    %4 = vector.extract_strided_slice %1 {offsets = [9, 0], sizes = [1, 128], strides = [1, 1]} : vector<144x128xf32> to vector<1x128xf32>
    %5 = vector.extract_strided_slice %0 {offsets = [0, 0], sizes = [16, 1], strides = [1, 1]} : vector<16x2xf32> to vector<16x1xf32>
    %6 = vector.broadcast %5 : vector<16x1xf32> to vector<16x128xf32>
    %7 = vector.broadcast %3 : vector<1x128xf32> to vector<16x128xf32>
    %8 = arith.mulf %6, %7 : vector<16x128xf32>
    %9 = vector.extract_strided_slice %0 {offsets = [0, 1], sizes = [16, 1], strides = [1, 1]} : vector<16x2xf32> to vector<16x1xf32>
    %10 = vector.broadcast %9 : vector<16x1xf32> to vector<16x128xf32>
    %11 = vector.broadcast %4 : vector<1x128xf32> to vector<16x128xf32>
    %12 = arith.mulf %10, %11 : vector<16x128xf32>
    %13 = arith.addf %8, %12 : vector<16x128xf32>
    %14 = vector.broadcast %2 : vector<1x128xf32> to vector<16x128xf32>
    %15 = arith.addf %13, %14 : vector<16x128xf32>
    %cst = arith.constant 0.000000e+00 : f32
    %16 = vector.broadcast %cst : f32 to vector<16x128xf32>
    %17 = arith.maximumf %15, %16 : vector<16x128xf32>
    %18 = vector.extract_strided_slice %1 {offsets = [1, 0], sizes = [1, 128], strides = [1, 1]} : vector<144x128xf32> to vector<1x128xf32>
    %19 = vector.extract_strided_slice %1 {offsets = [2, 0], sizes = [1, 128], strides = [1, 1]} : vector<144x128xf32> to vector<1x128xf32>
    %cst_3 = arith.constant dense<0.000000e+00> : vector<128xf32>
    %20 = vector.multi_reduction <add>, %17, %cst_3 [0] : vector<16x128xf32> to vector<128xf32>
    %21 = vector.shape_cast %20 : vector<128xf32> to vector<1x128xf32>
    %cst_4 = arith.constant 1.600000e+01 : f32
    %22 = vector.broadcast %cst_4 : f32 to vector<1x128xf32>
    %23 = arith.divf %21, %22 : vector<1x128xf32>
    %24 = arith.mulf %17, %17 : vector<16x128xf32>
    %cst_5 = arith.constant dense<0.000000e+00> : vector<128xf32>
    %25 = vector.multi_reduction <add>, %24, %cst_5 [0] : vector<16x128xf32> to vector<128xf32>
    %26 = vector.shape_cast %25 : vector<128xf32> to vector<1x128xf32>
    %cst_6 = arith.constant 1.600000e+01 : f32
    %27 = vector.broadcast %cst_6 : f32 to vector<1x128xf32>
    %28 = arith.divf %26, %27 : vector<1x128xf32>
    %29 = arith.mulf %23, %23 : vector<1x128xf32>
    %30 = arith.subf %28, %29 : vector<1x128xf32>
    %cst_7 = arith.constant 0.000000e+00 : f32
    %31 = vector.broadcast %cst_7 : f32 to vector<1x128xf32>
    %32 = arith.maximumf %30, %31 : vector<1x128xf32>
    %33 = vector.broadcast %23 : vector<1x128xf32> to vector<16x128xf32>
    %34 = arith.subf %17, %33 : vector<16x128xf32>
    %cst_8 = arith.constant 9.99999974E-6 : f32
    %35 = vector.broadcast %cst_8 : f32 to vector<1x128xf32>
    %36 = arith.addf %32, %35 : vector<1x128xf32>
    %37 = math.rsqrt %36 : vector<1x128xf32>
    %38 = vector.broadcast %37 : vector<1x128xf32> to vector<16x128xf32>
    %39 = arith.mulf %34, %38 : vector<16x128xf32>
    %40 = vector.broadcast %18 : vector<1x128xf32> to vector<16x128xf32>
    %41 = arith.mulf %39, %40 : vector<16x128xf32>
    %42 = vector.broadcast %19 : vector<1x128xf32> to vector<16x128xf32>
    %43 = arith.addf %41, %42 : vector<16x128xf32>
    %44 = vector.extract_strided_slice %1 {offsets = [16, 0], sizes = [128, 128], strides = [1, 1]} : vector<144x128xf32> to vector<128x128xf32>
    %45 = vector.extract_strided_slice %1 {offsets = [3, 0], sizes = [1, 128], strides = [1, 1]} : vector<144x128xf32> to vector<1x128xf32>
    %cst_9 = arith.constant dense<0.000000e+00> : vector<16x128xf32>
    %46 = tpu.matmul %43, %44, %cst_9 {dimension_numbers = #tpu.dot_dimension_numbers<[1], [0], [0], [1], [0, 0, 1, 1], [], []>} : vector<16x128xf32>, vector<128x128xf32>, vector<16x128xf32> -> vector<16x128xf32>
    %47 = vector.broadcast %45 : vector<1x128xf32> to vector<16x128xf32>
    %48 = arith.addf %46, %47 : vector<16x128xf32>
    %c0_10 = arith.constant 0 : index
    %c0_11 = arith.constant 0 : index
    %49 = vector.load %arg2[%c0_10, %c0_11] : memref<16x128xf32, #tpu.memory_space<vmem>>, vector<16x128xf32>
    tpu.vector_store %arg2[%c0_10, %c0_11], %48 {strides = array<i32>} : memref<16x128xf32, #tpu.memory_space<vmem>>, vector<16x128xf32>,
    return
  }
}

</mosaic_0001>

<bundles_post_ra>
// kernel: tpu_custom_call.1
= control target key start
LH: loop header
LB: loop body
LE: loop exit
PB: predicated region body
PF: predicated region fallthrough
CT: control target
= control target key end

     0   :  { %7 = vsyncpa [#allocation3], 0  ;;  %s429_s0 = inlined_call_operand.vmem [shape: f32[16,2], index: 0, kind: input, shape index: {}]   ;;  %s430_s1 = inlined_call_operand.hbm [shape: f32[144,128], index: 1, kind: input, shape index: {}]   ;;  %s431_s2 = inlined_call_operand.hbm [shape: f32[16,128], index: 2, kind: output, shape index: {}]  }
   0x1   :  { %8 = vsyncpa [#allocation4], 0  ;;  %s368_s9 = smov [#allocation2]   ;;  %s320_s13 = scalar_lea.hbm %s430_s1, 2304 }
   0x2   :  { %s16_s10 = sshll.u32 %s368_s9, 4  ;;  %p321_p0 = scmp.ne.s32.totalorder %s430_s1, %s320_s13  ;;  %s17_s10 = int_to_ptr.vmem [resolvable:$true] %s16_s10 }
   0x3   :  { %p324_p1 = scmp.lt.u32.totalorder %s320_s13, %s430_s1 }
   0x5   :  { %p326_p2 = pnand %p324_p1, %p321_p0 }
   0x7   :  { %329 = shalt.err (!%p326_p2)
}
   0x8   :  { %s330_s18 = scalar_lea.vmem %s17_s10, 2304  ;;  %p335_p4 = scmp.lt.s32.totalorder %s17_s10, %s17_s10 }
   0x9   :  { %p331_p3 = scmp.ne.s32.totalorder %s17_s10, %s330_s18  ;;  %p336_p5 = scmp.lt.s32.totalorder %s330_s18, %s330_s18 }
   0xb   :  { %p337_p6 = por %p336_p5, %p335_p4 }
   0xd   :  { %p338_p7 = pnand %p337_p6, %p331_p3 }
   0xf   :  { %341 = shalt.err (!%p338_p7)
}
  0x10   :  { %s369_s19 = smov 128   ;;  %s370_s20 = smov 8  }
  0x11   :  { %22 = dma.hbm_to_vmem [thread:$0]  %s430_s1, 2304, %s17_s10, [#allocation3], %s369_s19, %s369_s19, %s370_s20  }
  0x12   :  { %364 = dma.done.wait [#allocation3], 2304  }
  0x13   :  { %365 = vsyncadd [#allocation3], 4294964992  ;;  %v371_v0 = vmov 1   ;;  %v372_v1 = vmov 0   ;;  %v26_v2 = vld [vmem:[%s429_s0] sm:$0xff]  ;;  %v27_v3 = vld [vmem:[%s429_s0 + $0x8] sm:$0xff]  ;;  %v56_v28 = vlaneseq }
  0x14   :  { %316 = vset.pattern.permute.xlu1 %v371_v0  ;;  %315 = vset.pattern.permute.xlu0 %v372_v1  ;;  %v30_v4 = vld [vmem:[#allocation2 + $0x10] sm:$0xff]  ;;  %v31_v5 = vld [vmem:[#allocation2 + $0x18] sm:$0xff]  ;;  %v32_v7 = vld [vmem:[#allocation2 + $0x20] sm:$0xff]  ;;  %s373_s0 = smov [#allocation5]  }
  0x15   :  { %63 = vperm.xlu1 %316, %v26_v2   ;;  %48 = vperm.xlu0 %315, %v26_v2   ;;  %v277_v6 = vpack.c.bf16 %v31_v5, %v30_v4  ;;  %v33_v8 = vld [vmem:[#allocation2 + $0x28] sm:$0xff]  ;;  %v34_v10 = vld [vmem:[#allocation2 + $0x30] sm:$0xff]  ;;  %v35_v11 = vld [vmem:[#allocation2 + $0x38] sm:$0xff]  ;;  %v57_v29 = vshrl.u32 %v56_v28, 7  ;;  %s212_s1 = sshll.u32 %s373_s0, 4  ;;  %s213_s1 = int_to_ptr.vmem [resolvable:$true] %s212_s1 }
  0x16   :  { %v281_v9 = vpack.c.bf16 %v33_v8, %v32_v7  ;;  %v285_v12 = vpack.c.bf16 %v35_v11, %v34_v10  ;;  %v36_v13 = vld [vmem:[#allocation2 + $0x40] sm:$0xff]  ;;  %v37_v14 = vld [vmem:[#allocation2 + $0x48] sm:$0xff]  ;;  %v38_v16 = vld [vmem:[#allocation2 + $0x50] sm:$0xff]  ;;  %s342_s27 = scalar_lea.vmem %s213_s1, 256  ;;  %p347_p9 = scmp.lt.s32.totalorder %s213_s1, %s213_s1 }
  0x17   :  { %278 = vmatprep.subr.bf16.mxu0 %v277_v6  ;;  %v289_v15 = vpack.c.bf16 %v37_v14, %v36_v13  ;;  %v39_v17 = vld [vmem:[#allocation2 + $0x58] sm:$0xff]  ;;  %v40_v19 = vld [vmem:[#allocation2 + $0x60] sm:$0xff]  ;;  %v41_v20 = vld [vmem:[#allocation2 + $0x68] sm:$0xff]  ;;  %v128_v30 = vsub.s32 3, %v57_v29  ;;  %v72_v33 = vsub.s32 1, %v57_v29  ;;  %v58_v34 = vsub.s32 0, %v57_v29  ;;  %p343_p8 = scmp.ne.s32.totalorder %s213_s1, %s342_s27  ;;  %p348_p10 = scmp.lt.s32.totalorder %s342_s27, %s342_s27 }
  0x18   :  { %280 = vmatpush3.bf16.msra.mxu0 %v277_v6  ;;  %v293_v18 = vpack.c.bf16 %v39_v17, %v38_v16  ;;  %v297_v21 = vpack.c.bf16 %v41_v20, %v40_v19  ;;  %v42_v22 = vld [vmem:[#allocation2 + $0x70] sm:$0xff]  ;;  %v43_v23 = vld [vmem:[#allocation2 + $0x78] sm:$0xff]  ;;  %v44_v25 = vld [vmem:[#allocation2 + $0x80] sm:$0xff]  ;;  %v122_v11 = vsub.s32 2, %v57_v29 }
  0x19   :  { %67 = vperm.xlu1 %316, %v27_v3   ;;  %53 = vperm.xlu0 %315, %v27_v3   ;;  %v301_v24 = vpack.c.bf16 %v43_v23, %v42_v22  ;;  %v45_v26 = vld [vmem:[#allocation2 + $0x88] sm:$0xff]  ;;  %v28_v31 = vld [vmem:[#allocation2] sm:$0xff]  ;;  %p349_p11 = por %p348_p10, %p347_p9 }
  0x1a   :  { %282 = vmatprep.subr.bf16.mxu0 %v281_v9  ;;  %v305_v27 = vpack.c.bf16 %v45_v26, %v44_v25  ;;  %v410_v32 = vrot.slane %v28_v31, %v128_v30  ;;  %v29_v35 = vld [vmem:[#allocation2 + $0x8] sm:$0xff]  ;;  %v81_v41 = vrot.slane %v28_v31, %v58_v34  ;;  %v117_v14 = vrot.slane %v28_v31, %v72_v33 }
  0x1b   :  { %v73_v36 = vrot.slane %v29_v35, %v72_v33  ;;  %v59_v37 = vrot.slane %v29_v35, %v58_v34  ;;  %v123_v17 = vrot.slane %v28_v31, %v122_v11  ;;  %p350_p12 = pnand %p349_p11, %p343_p8 }
  0x1c   :  { %284 = vmatpush3.bf16.msra.mxu0 %v281_v9 }
  0x1d   :  { %317 = vset.pattern.permute.xlu0 %v371_v0  ;;  %286 = vmatprep.subr.bf16.mxu0 %v285_v12 }
  0x20   :  { %288 = vmatpush3.bf16.msra.mxu0 %v285_v12 }
  0x21   :  { %290 = vmatprep.subr.bf16.mxu0 %v289_v15 }
  0x24   :  { %292 = vmatpush3.bf16.msra.mxu0 %v289_v15 }
  0x25   :  { %294 = vmatprep.subr.bf16.mxu0 %v293_v18 }
  0x28   :  { %296 = vmatpush3.bf16.msra.mxu0 %v293_v18 }
  0x29   :  { %298 = vmatprep.subr.bf16.mxu0 %v297_v21 }
  0x2c   :  { %300 = vmatpush3.bf16.msra.mxu0 %v297_v21 }
  0x2d   :  { %302 = vmatprep.subr.bf16.mxu0 %v301_v24 }
  0x30   :  { %304 = vmatpush3.bf16.msra.mxu0 %v301_v24 }
  0x31   :  { %306 = vmatprep.subr.bf16.mxu0 %v305_v27 }
  0x34   :  { %308 = vmatpush3.bf16.msra.mxu0 %v305_v27 }
  0x94   :  { %v64_v38 = vpop.permute.xlu1 %63  ;;  %v49_v39 = vpop.permute.xlu0 %48 }
  0x95   :  { %v74_v40 = vmul.f32 %v73_v36, %v64_v38  ;;  %v60_v42 = vmul.f32 %v59_v37, %v49_v39 }
  0x97   :  { %v76_v43 = vadd.f32 %v74_v40, %v60_v42 }
  0x98   :  { %v68_v44 = vpop.permute.xlu1 %67  ;;  %v54_v45 = vpop.permute.xlu0 %53 }
  0x99   :  { %v82_v46 = vadd.f32 %v81_v41, %v76_v43  ;;  %v75_v47 = vmul.f32 %v73_v36, %v68_v44  ;;  %v61_v48 = vmul.f32 %v59_v37, %v54_v45 }
  0x9b   :  { %v77_v49 = vadd.f32 %v75_v47, %v61_v48  ;;  %v84_v50 = vmax.f32 %v82_v46, 0.0 }
  0x9d   :  { %v83_v51 = vadd.f32 %v81_v41, %v77_v49  ;;  %v95_v53 = vmul.f32 %v84_v50, %v84_v50 }
  0x9f   :  { %v85_v52 = vmax.f32 %v83_v51, 0.0 }
  0xa1   :  { %v86_v54 = vadd.f32 %v85_v52, %v84_v50  ;;  %v96_v55 = vmul.f32 %v85_v52, %v85_v52 }
  0xa3   :  { %v87_v56 = vrot.slane %v86_v54, 4  ;;  %v97_v57 = vadd.f32 %v96_v55, %v95_v53 }
  0xa5   :  { %v88_v58 = vadd.f32 %v87_v56, %v86_v54  ;;  %v98_v59 = vrot.slane %v97_v57, 4 }
  0xa7   :  { %v89_v60 = vrot.slane %v88_v58, 2  ;;  %v99_v61 = vadd.f32 %v98_v59, %v97_v57 }
  0xa9   :  { %v90_v62 = vadd.f32 %v89_v60, %v88_v58  ;;  %v100_v63 = vrot.slane %v99_v61, 2 }
  0xab   :  { %v91_v0 = vrot.slane %v90_v62, 1  ;;  %v101_v1 = vadd.f32 %v100_v63, %v99_v61 }
  0xad   :  { %v92_v2 = vadd.f32 %v91_v0, %v90_v62  ;;  %v102_v3 = vrot.slane %v101_v1, 1 }
  0xaf   :  { %v94_v4 = vmul.f32 0.0625, %v92_v2  ;;  %v103_v5 = vadd.f32 %v102_v3, %v101_v1 }
  0xb1   :  { %v104_v6 = vmul.f32 0.0625, %v103_v5  ;;  %v105_v7 = vmul.f32 %v94_v4, %v94_v4  ;;  %v109_v12 = vsub.f32 %v85_v52, %v94_v4  ;;  %v108_v13 = vsub.f32 %v84_v50, %v94_v4 }
  0xb3   :  { %v106_v8 = vsub.f32 %v104_v6, %v105_v7 }
  0xb5   :  { %v107_v9 = vmax.f32 %v106_v8, 0.0 }
  0xb7   :  { %v110_v10 = vadd.f32 1e-05, %v107_v9 }
  0xb9   :  { %318 = vrsqrt.f32 %v110_v10 }
  0xc3   :  { %v319_v15 = vpop.eup %318 }
  0xc4   :  { %v112_v16 = vmul.f32 %v319_v15, %v108_v13  ;;  %v113_v18 = vmul.f32 %v319_v15, %v109_v12 }
  0xc6   :  { %v118_v19 = vmul.f32 %v117_v14, %v112_v16  ;;  %v119_v20 = vmul.f32 %v117_v14, %v113_v18 }
  0xc8   :  { %v124_v21 = vadd.f32 %v123_v17, %v118_v19  ;;  %v125_v22 = vadd.f32 %v123_v17, %v119_v20 }
  0xca   :  { %274 = vmatprep.mubr.f32.mxu0 %v124_v21 }
  0xcb   :  { %275 = vmatmul.mubr.f32.vlgmr.msra.gmra.mrb[0].mxu0 %v125_v22 }
 0x19e   :  { %v276_v23 = vpop.f32.mrb[0].mxu0 }
 0x19f   :  { %v202_v24 = vadd.f32 %v276_v23, %v410_v32  ;;  %v196_v25 = vpop.f32.mrb[1].mxu0 }
 0x1a0   :  { %v197_v26 = vadd.f32 %v196_v25, %v410_v32 }
 0x1a1   :  { %206 = vst [vmem:[#allocation5 + $0x8] sm:$0xff] %v202_v24 }
 0x1a2   :  { %205 = vst [vmem:[#allocation5] sm:$0xff] %v197_v26 }
 0x1a3   :  { %353 = shalt.err (!%p350_p12)
}
 0x1a4   :  { %s354_s30 = scalar_lea.hbm %s431_s2, 256 }
 0x1a5   :  { %p355_p13 = scmp.ne.s32.totalorder %s431_s2, %s354_s30  ;;  %p358_p0 = scmp.lt.u32.totalorder %s354_s30, %s431_s2 }
 0x1a7   :  { %p360_p1 = pnand %p358_p0, %p355_p13 }
 0x1a9   :  { %363 = shalt.err (!%p360_p1)
}
 0x1aa   :  { %218 = dma.vmem_to_hbm [thread:$0]  %s213_s1, 256, %s431_s2, [#allocation4], %s369_s19, %s369_s19, %s370_s20  }
 0x1ab   :  { %366 = dma.done.wait [#allocation4], 256  }
 0x1ac   :  { %367 = vsyncadd [#allocation4], 4294967040 }
 0x1ad   :  { %222 = vsyncpa [#allocation3], 1 }
 0x1ae   :  { %223 = vsyncpa [#allocation4], 1 }

</bundles_post_ra>
